<compile_context>
chip_gen: v5e
topology: v5e:2x2
jax: 0.10.0
libtpu: 0.0.40
codegen_flags: <defaults>
</compile_context>

<pallas_src>
import jax
import jax.numpy as jnp
from jax.experimental import pallas as pl
from jax.experimental.pallas import tpu as pltpu

BN_EPS = 1e-5
LANE = 128
FUSE_DIN_THRESHOLD = 512  # recompute x @ w1 in pass 2 when D_in_p <= this


def _cdiv(a, b):
    return -(-a // b)


def _round_up(x, m):
    return ((x + m - 1) // m) * m


def _chip_config():
    """(vmem_limit_bytes, block_b cap) sized for the local chip generation."""
    try:
        vmem_cap = int(pltpu.get_tpu_info().vmem_capacity_bytes)
    except Exception:  # conservative default: v7x-sized 64 MiB
        vmem_cap = 64 << 20
    vmem_limit = max(32 << 20, min((vmem_cap * 3) // 4, 100 << 20))
    block_cap = 1024 if vmem_limit >= (80 << 20) else 512
    return vmem_limit, block_cap


def _stationary_spec(block_shape, index_map):
    """Weight-stationary / resident block: constant index_map => 1 buffer."""
    try:
        return pl.BlockSpec(block_shape, index_map, pipeline_mode=pl.Buffered(1))
    except TypeError:  # older Pallas without pipeline_mode: default buffering
        return pl.BlockSpec(block_shape, index_map)


def _pad2d(a, rows, cols, dtype):
    a = a.astype(dtype)
    if a.shape == (rows, cols):
        return a  # already aligned: skip the extra HBM read+write of a pad copy
    return jnp.zeros((rows, cols), dtype).at[: a.shape[0], : a.shape[1]].set(a)


# --------------------------------------------------------------------------- #
# Kernels.  Linear1's bias is intentionally omitted everywhere: train-mode BN
# subtracts the batch mean, which cancels a per-feature constant bias exactly.
# --------------------------------------------------------------------------- #
def _write_partial_stats(h, stats_ref):
    # Per-tile partial batch statistics in f32, packed into one lane-dense
    # (1, 8, H_p) block: sublane 0 = sum(h), sublane 1 = sum(h*h), rest 0.
    ssum = jnp.sum(h, axis=0, keepdims=True)
    ssq = jnp.sum(h * h, axis=0, keepdims=True)
    row = jax.lax.broadcasted_iota(jnp.int32, (8, h.shape[-1]), 0)
    blk = jnp.where(row == 0, ssum, jnp.where(row == 1, ssq, 0.0))
    stats_ref[...] = blk[None]


def linear1_stats_kernel(x_ref, w1_ref, stats_ref):
    # Fused path, pass 1: statistics only; h never touches HBM.
    h = jnp.dot(x_ref[...], w1_ref[...], preferred_element_type=jnp.float32)
    _write_partial_stats(h, stats_ref)


def linear1_store_stats_kernel(x_ref, w1_ref, h_ref, stats_ref):
    # Large-D_in path, pass 1: also stream h back to HBM (bf16 on fast path).
    h = jnp.dot(x_ref[...], w1_ref[...], preferred_element_type=jnp.float32)
    h_ref[...] = h.astype(h_ref.dtype)
    _write_partial_stats(h, stats_ref)


def fused_fwd_kernel(x_ref, w1_ref, scale_ref, shift_ref, w2_ref, b2_ref, o_ref):
    # Fused path, pass 2: recompute x @ w1, folded BN + ReLU, then Linear2.
    h = jnp.dot(x_ref[...], w1_ref[...], preferred_element_type=jnp.float32)
    a = jnp.maximum(h * scale_ref[...] + shift_ref[...], 0.0)
    o_ref[...] = (
        jnp.dot(a.astype(w2_ref.dtype), w2_ref[...],
                preferred_element_type=jnp.float32)
        + b2_ref[...]
    ).astype(o_ref.dtype)


def bn_relu_linear2_kernel(h_ref, scale_ref, shift_ref, w2_ref, b2_ref, o_ref):
    # Large-D_in path, pass 2: folded BN + ReLU + Linear2 on the streamed h.
    h = h_ref[...].astype(jnp.float32)
    a = jnp.maximum(h * scale_ref[...] + shift_ref[...], 0.0)
    o_ref[...] = (
        jnp.dot(a.astype(w2_ref.dtype), w2_ref[...],
                preferred_element_type=jnp.float32)
        + b2_ref[...]
    ).astype(o_ref.dtype)


# --------------------------------------------------------------------------- #
# Wrapper.
# --------------------------------------------------------------------------- #
def mlp_forward(x, w1, b1, gamma, beta, w2, b2, *,
                use_bf16_matmul=True, block_b=None, fuse=None, bn_eps=BN_EPS):
    # b1 accepted for parameter parity with nn.Linear but unused: train-mode
    # BatchNorm mean subtraction cancels it exactly (see kernels above).
    del b1
    B, D_in = x.shape
    H = w1.shape[1]
    D_out = w2.shape[1]
    f32 = jnp.float32
    store_dtype = jnp.bfloat16 if use_bf16_matmul else jnp.float32
    sb = jnp.dtype(store_dtype).itemsize

    # Lane-dense padding of feature dims (unmasked vst, full MXU lanes).
    D_in_p = _round_up(D_in, LANE)
    H_p = _round_up(H, LANE)
    D_out_p = _round_up(D_out, LANE)

    vmem_limit, block_cap = _chip_config()

    # Fused path: skip the h HBM round-trip (write+read of B_p*H_p) and
    # recompute x @ w1 in pass 2 when the duplicated flops are cheap and both
    # weight matrices fit comfortably resident in VMEM.
    resident_fused = (D_in_p * H_p + H_p * D_out_p) * sb
    if fuse is None:
        fuse = (D_in_p <= FUSE_DIN_THRESHOLD) and (resident_fused <= vmem_limit // 3)

    # TODO(synk): for hidden/feature sizes where a single weight matrix no
    # longer fits in the VMEM budget (earliest on v7x's 64 MiB), add an
    # H-/D_out-tile grid axis with an f32 VMEM scratch accumulator (P3) instead
    # of fully-resident weights.

    # ---- block_b: sized from per-pass streamed bytes, padded without blow-up.
    gran = 16 if store_dtype == jnp.bfloat16 else 8  # bf16 packs 2 rows/sublane
    if fuse:
        row1 = D_in_p * sb                        # pass 1 streams x
        row2 = D_in_p * sb + D_out_p * 4          # pass 2 streams x + out (f32)
        resident = resident_fused
    else:
        row1 = (D_in_p + H_p) * sb                # pass 1 streams x + h
        row2 = H_p * sb + D_out_p * 4             # pass 2 streams h + out (f32)
        resident = max(D_in_p * H_p, H_p * D_out_p) * sb
    if block_b is None:
        stream_budget = max(vmem_limit - resident - (4 << 20), 1 << 20)
        rows = stream_budget // (2 * max(row1, row2))  # double-buffered streams
        cap = max(gran, min(block_cap, (rows // gran) * gran))
        # Spread B over ceil(B / cap) tiles so padding stays small instead of
        # round_up(B, cap) nearly doubling the work for awkward batch sizes.
        n_tiles = max(1, _cdiv(B, cap))
        block_b = min(cap, _round_up(_cdiv(B, n_tiles), gran))
    block_b = max(gran, (block_b // gran) * gran)
    B_p = _round_up(B, block_b)
    grid_b = B_p // block_b

    # ---- padded operands (pad copies skipped when already aligned) --------- #
    x_p = _pad2d(x, B_p, D_in_p, store_dtype)
    w1_p = _pad2d(w1, D_in_p, H_p, store_dtype)
    w2_p = _pad2d(w2, H_p, D_out_p, store_dtype)
    gamma_p = _pad2d(gamma.reshape(1, -1), 1, H_p, f32)
    beta_p = _pad2d(beta.reshape(1, -1), 1, H_p, f32)
    b2_p = _pad2d(b2.reshape(1, -1), 1, D_out_p, f32)

    # ---- shared specs ------------------------------------------------------ #
    x_spec = pl.BlockSpec((block_b, D_in_p), lambda i: (i, 0))        # streamed
    w1_spec = _stationary_spec((D_in_p, H_p), lambda i: (0, 0))       # stationary
    w2_spec = _stationary_spec((H_p, D_out_p), lambda i: (0, 0))      # stationary
    scale_spec = _stationary_spec((1, H_p), lambda i: (0, 0))
    shift_spec = _stationary_spec((1, H_p), lambda i: (0, 0))
    b2_spec = _stationary_spec((1, D_out_p), lambda i: (0, 0))
    stats_spec = pl.BlockSpec((1, 8, H_p), lambda i: (i, 0, 0))       # per-tile
    stats_shape = jax.ShapeDtypeStruct((grid_b, 8, H_p), f32)
    parallel = pltpu.CompilerParams(
        dimension_semantics=("parallel",), vmem_limit_bytes=vmem_limit)

    # ---- pass 1: Linear1 (+ optional h store) + per-tile batch stats ------- #
    if fuse:
        cost1 = pl.CostEstimate(
            flops=2 * B_p * D_in_p * H_p + 4 * B_p * H_p,
            transcendentals=0,
            bytes_accessed=(B_p * D_in_p + D_in_p * H_p) * sb
            + grid_b * 8 * H_p * 4,
        )
        stats = pl.pallas_call(
            linear1_stats_kernel,
            grid=(grid_b,),
            in_specs=[x_spec, w1_spec],
            out_specs=stats_spec,
            out_shape=stats_shape,
            compiler_params=parallel,
            cost_estimate=cost1,
        )(x_p, w1_p)
        h = None
    else:
        cost1 = pl.CostEstimate(
            flops=2 * B_p * D_in_p * H_p + 4 * B_p * H_p,
            transcendentals=0,
            bytes_accessed=(B_p * D_in_p + D_in_p * H_p + B_p * H_p) * sb
            + grid_b * 8 * H_p * 4,
        )
        h, stats = pl.pallas_call(
            linear1_store_stats_kernel,
            grid=(grid_b,),
            in_specs=[x_spec, w1_spec],
            out_specs=[pl.BlockSpec((block_b, H_p), lambda i: (i, 0)), stats_spec],
            out_shape=[jax.ShapeDtypeStruct((B_p, H_p), store_dtype), stats_shape],
            compiler_params=parallel,
            cost_estimate=cost1,
        )(x_p, w1_p)

    # ---- fold train-mode BN into one per-feature scale/shift (tiny H math) - #
    bsum = jnp.sum(stats[:, 0, :], axis=0, keepdims=True)       # (1, H_p) f32
    bsumsq = jnp.sum(stats[:, 1, :], axis=0, keepdims=True)
    inv_b = 1.0 / B   # real batch size: padded zero rows contribute 0 to sums
    mean = bsum * inv_b
    # TODO(synk): E[h^2] - mean^2 cancels badly if |mean| >> std(h); switch to a
    # Welford/M2-style accumulation if inputs can carry large per-feature offsets.
    var = jnp.maximum(bsumsq * inv_b - mean * mean, 0.0)
    scale = gamma_p * jax.lax.rsqrt(var + bn_eps)
    shift = beta_p - mean * scale

    # ---- pass 2: (recompute Linear1 |) folded BN + ReLU + Linear2 ---------- #
    out_spec = pl.BlockSpec((block_b, D_out_p), lambda i: (i, 0))
    out_shape = jax.ShapeDtypeStruct((B_p, D_out_p), f32)
    if fuse:
        cost2 = pl.CostEstimate(
            flops=2 * B_p * (D_in_p * H_p + H_p * D_out_p) + 3 * B_p * H_p,
            transcendentals=0,
            bytes_accessed=(B_p * D_in_p + D_in_p * H_p + H_p * D_out_p) * sb
            + 4 * (2 * H_p + D_out_p + B_p * D_out_p),
        )
        out_p = pl.pallas_call(
            fused_fwd_kernel,
            grid=(grid_b,),
            in_specs=[x_spec, w1_spec, scale_spec, shift_spec, w2_spec, b2_spec],
            out_specs=out_spec,
            out_shape=out_shape,
            compiler_params=parallel,
            cost_estimate=cost2,
        )(x_p, w1_p, scale, shift, w2_p, b2_p)
    else:
        cost2 = pl.CostEstimate(
            flops=2 * B_p * H_p * D_out_p + 3 * B_p * H_p,
            transcendentals=0,
            bytes_accessed=(B_p * H_p + H_p * D_out_p) * sb
            + 4 * (2 * H_p + D_out_p + B_p * D_out_p),
        )
        out_p = pl.pallas_call(
            bn_relu_linear2_kernel,
            grid=(grid_b,),
            in_specs=[pl.BlockSpec((block_b, H_p), lambda i: (i, 0)),
                      scale_spec, shift_spec, w2_spec, b2_spec],
            out_specs=out_spec,
            out_shape=out_shape,
            compiler_params=parallel,
            cost_estimate=cost2,
        )(h, scale, shift, w2_p, b2_p)

    return out_p[:B, :D_out]


def init_params(key, input_dim, hidden_dim, output_dim):
    k1, k2, k3, k4 = jax.random.split(key, 4)
    # PyTorch Linear default init: U(-1/sqrt(fan_in), 1/sqrt(fan_in)).
    lim1 = 1.0 / jnp.sqrt(input_dim)
    lim2 = 1.0 / jnp.sqrt(hidden_dim)
    # Weights stored already transposed: (in, out).
    w1 = jax.random.uniform(k1, (input_dim, hidden_dim), jnp.float32, -lim1, lim1)
    b1 = jax.random.uniform(k2, (hidden_dim,), jnp.float32, -lim1, lim1)
    w2 = jax.random.uniform(k3, (hidden_dim, output_dim), jnp.float32, -lim2, lim2)
    b2 = jax.random.uniform(k4, (output_dim,), jnp.float32, -lim2, lim2)
    # BatchNorm1d default affine params.
    gamma = jnp.ones((hidden_dim,), jnp.float32)
    beta = jnp.zeros((hidden_dim,), jnp.float32)
    return w1, b1, gamma, beta, w2, b2


def reference_forward(x, w1, b1, gamma, beta, w2, b2, eps=BN_EPS):
    h = x @ w1 + b1
    mean = jnp.mean(h, axis=0, keepdims=True)
    var = jnp.mean((h - mean) ** 2, axis=0, keepdims=True)
    h = (h - mean) / jnp.sqrt(var + eps)
    h = h * gamma + beta
    h = jnp.maximum(h, 0.0)
    return h @ w2 + b2


if __name__ == "__main__":
    batch, input_dim, hidden_dim, output_dim = 8, 16, 32, 8

    key = jax.random.PRNGKey(0)
    kx, kp = jax.random.split(key)
    x = jax.random.normal(kx, (batch, input_dim), jnp.float32)
    params = init_params(kp, input_dim, hidden_dim, output_dim)

    ref = reference_forward(x, *params)

    # Exact-precision path, fused (h recomputed, never stored).
    out_f32 = jax.block_until_ready(mlp_forward(x, *params, use_bf16_matmul=False))
    assert out_f32.shape == (batch, output_dim)
    assert jnp.allclose(out_f32, ref, atol=1e-4, rtol=1e-4)

    # Exact-precision path, streamed-h (large-D_in code path).
    out_f32_s = jax.block_until_ready(
        mlp_forward(x, *params, use_bf16_matmul=False, fuse=False))
    assert jnp.allclose(out_f32_s, ref, atol=1e-4, rtol=1e-4)

    # Fast path: bf16 storage + bf16 MXU / f32 accumulation, fused.
    out_bf16 = jax.block_until_ready(mlp_forward(x, *params, use_bf16_matmul=True))
    assert out_bf16.shape == (batch, output_dim)
    assert jnp.allclose(out_bf16, ref, atol=5e-2, rtol=5e-2)

    # Fast path, streamed bf16 h (large-D_in code path).
    out_bf16_s = jax.block_until_ready(
        mlp_forward(x, *params, use_bf16_matmul=True, fuse=False))
    assert jnp.allclose(out_bf16_s, ref, atol=5e-2, rtol=5e-2)

    print("KERNEL_OK")
</pallas_src>

<mosaic_0001>
module attributes {stable_mosaic.version = 11 : i64} {
  func.func @linear1_stats_kernel(%arg0: i32, %arg1: memref<8x128xf32, #tpu.memory_space<vmem>>, %arg2: memref<128x128xf32, #tpu.memory_space<vmem>>, %arg3: memref<1x8x128xf32, #tpu.memory_space<vmem>>) attributes {dimension_semantics = [#tpu.dimension_semantics<parallel>], iteration_bounds = array<i64: 1>, scalar_prefetch = 0 : i64, scratch_operands = 0 : i64, tpu.core_type = #tpu.core_type<tc>, window_params = [{transform_indices = @transform_0, window_bounds = array<i64: 8, 128>}, {pipeline_mode = #tpu.pipeline_mode<synchronous>, transform_indices = @transform_1, window_bounds = array<i64: 128, 128>}, {transform_indices = @transform_2, window_bounds = array<i64: 1, 8, 128>}]} {
    %c0 = arith.constant 0 : index
    %c0_0 = arith.constant 0 : index
    %0 = vector.load %arg1[%c0, %c0_0] : memref<8x128xf32, #tpu.memory_space<vmem>>, vector<8x128xf32>
    %c0_1 = arith.constant 0 : index
    %c0_2 = arith.constant 0 : index
    %1 = vector.load %arg2[%c0_1, %c0_2] : memref<128x128xf32, #tpu.memory_space<vmem>>, vector<128x128xf32>
    %cst = arith.constant dense<0.000000e+00> : vector<8x128xf32>
    %2 = tpu.matmul %0, %1, %cst {dimension_numbers = #tpu.dot_dimension_numbers<[1], [0], [0], [1], [0, 0, 1, 1], [], []>} : vector<8x128xf32>, vector<128x128xf32>, vector<8x128xf32> -> vector<8x128xf32>
    %cst_3 = arith.constant dense<0.000000e+00> : vector<128xf32>
    %3 = vector.multi_reduction <add>, %2, %cst_3 [0] : vector<8x128xf32> to vector<128xf32>
    %4 = vector.shape_cast %3 : vector<128xf32> to vector<1x128xf32>
    %5 = arith.mulf %2, %2 : vector<8x128xf32>
    %cst_4 = arith.constant dense<0.000000e+00> : vector<128xf32>
    %6 = vector.multi_reduction <add>, %5, %cst_4 [0] : vector<8x128xf32> to vector<128xf32>
    %7 = vector.shape_cast %6 : vector<128xf32> to vector<1x128xf32>
    %8 = tpu.iota {dimensions = array<i32: 0>} : vector<8x128xi32>
    %c0_i32 = arith.constant 0 : i32
    %9 = vector.broadcast %c0_i32 : i32 to vector<8x128xi32>
    %10 = arith.cmpi eq, %8, %9 : vector<8x128xi32>
    %c1_i32 = arith.constant 1 : i32
    %11 = vector.broadcast %c1_i32 : i32 to vector<8x128xi32>
    %12 = arith.cmpi eq, %8, %11 : vector<8x128xi32>
    %cst_5 = arith.constant 0.000000e+00 : f32
    %13 = vector.shape_cast %7 : vector<1x128xf32> to vector<1x128xf32>
    %14 = vector.broadcast %13 : vector<1x128xf32> to vector<8x128xf32>
    %15 = vector.broadcast %cst_5 : f32 to vector<8x128xf32>
    %16 = arith.select %12, %14, %15 : vector<8x128xi1>, vector<8x128xf32>
    %17 = vector.shape_cast %4 : vector<1x128xf32> to vector<1x128xf32>
    %18 = vector.broadcast %17 : vector<1x128xf32> to vector<8x128xf32>
    %19 = arith.select %10, %18, %16 : vector<8x128xi1>, vector<8x128xf32>
    %20 = vector.shape_cast %19 : vector<8x128xf32> to vector<1x8x128xf32>
    %c0_6 = arith.constant 0 : index
    %c0_7 = arith.constant 0 : index
    %c0_8 = arith.constant 0 : index
    %21 = vector.load %arg3[%c0_6, %c0_7, %c0_8] : memref<1x8x128xf32, #tpu.memory_space<vmem>>, vector<1x8x128xf32>
    tpu.vector_store %arg3[%c0_6, %c0_7, %c0_8], %20 {strides = array<i32>} : memref<1x8x128xf32, #tpu.memory_space<vmem>>, vector<1x8x128xf32>,
    return
  }
  func.func @transform_0(%arg0: i32) -> (i32, i32) {
    %c0_i32 = arith.constant 0 : i32
    %c0_i32_0 = arith.constant 0 : i32
    return %arg0, %c0_i32 : i32, i32
  }
  func.func @transform_1(%arg0: i32) -> (i32, i32) {
    %c0_i32 = arith.constant 0 : i32
    %c0_i32_0 = arith.constant 0 : i32
    %c0_i32_1 = arith.constant 0 : i32
    return %c0_i32, %c0_i32_0 : i32, i32
  }
  func.func @transform_2(%arg0: i32) -> (i32, i32, i32) {
    %c0_i32 = arith.constant 0 : i32
    %c0_i32_0 = arith.constant 0 : i32
    %c0_i32_1 = arith.constant 0 : i32
    return %arg0, %c0_i32, %c0_i32_0 : i32, i32, i32
  }
}

</mosaic_0001>

<bundles_post_ra>
// kernel: tpu_custom_call.1
= control target key start
LH: loop header
LB: loop body
LE: loop exit
PB: predicated region body
PF: predicated region fallthrough
CT: control target
= control target key end

     0   :  { %7 = vsyncpa [#allocation3], 0  ;;  %s229_s0 = inlined_call_operand.hbm [shape: f32[8,128], index: 0, kind: input, shape index: {}]   ;;  %s230_s1 = inlined_call_operand.hbm [shape: f32[128,128], index: 1, kind: input, shape index: {}]   ;;  %s231_s2 = inlined_call_operand.hbm [shape: f32[1,8,128], index: 2, kind: output, shape index: {}]  }
   0x1   :  { %8 = vsyncpa [#allocation6], 0 }
   0x2   :  { %9 = vsyncpa [#allocation4], 0  ;;  %s15_s11 = sshll.u32 %s229_s0, 4  ;;  %s200_s12 = smov [#allocation2]   ;;  %s16_s11 = int_to_ptr.hbm [resolvable:$true] %s15_s11 }
   0x3   :  { %s17_s13 = sshll.u32 %s200_s12, 4  ;;  %s25_s16 = sshll.u32 %s230_s1, 4  ;;  %s18_s13 = int_to_ptr.vmem [resolvable:$true] %s17_s13  ;;  %s26_s16 = int_to_ptr.hbm [resolvable:$true] %s25_s16 }
   0x4   :  { %20 = dma.hbm_to_vmem [thread:$0]  %s16_s11, 128, %s18_s13, [#allocation3]  }
   0x5   :  { %s201_s17 = smov [#allocation5]   ;;  %s202_s19 = smov 128  }
   0x6   :  { %s27_s18 = sshll.u32 %s201_s17, 4  ;;  %s203_s20 = smov 8   ;;  %s28_s18 = int_to_ptr.vmem [resolvable:$true] %s27_s18 }
   0x7   :  { %33 = dma.hbm_to_vmem [thread:$0]  %s26_s16, 2048, %s28_s18, [#allocation6], %s202_s19, %s202_s19, %s203_s20  }
   0x8   :  { %194 = dma.done.wait [#allocation3], 128  }
   0x9   :  { %195 = vsyncadd [#allocation3], 4294967168 }
   0xa   :  { %196 = dma.done.wait [#allocation6], 2048  }
   0xb   :  { %197 = vsyncadd [#allocation6], 4294965248  ;;  %v58_v0 = vld [vmem:[#allocation5 + $0x78] sm:$0xff]  ;;  %v57_v1 = vld [vmem:[#allocation5 + $0x70] sm:$0xff]  ;;  %v92_v22 = vlaneseq  ;;  %s204_s0 = smov [#allocation7]   ;;  %s106_s23 = sshll.u32 %s231_s2, 4  ;;  %s107_s23 = int_to_ptr.hbm [resolvable:$true] %s106_s23 }
   0xc   :  { %59 = vmatpush.msra.mxu0 %v58_v0  ;;  %v56_v2 = vld [vmem:[#allocation5 + $0x68] sm:$0xff]  ;;  %v55_v3 = vld [vmem:[#allocation5 + $0x60] sm:$0xff]  ;;  %v54_v4 = vld [vmem:[#allocation5 + $0x58] sm:$0xff]  ;;  %s104_s1 = sshll.u32 %s204_s0, 4  ;;  %s105_s1 = int_to_ptr.vmem [resolvable:$true] %s104_s1 }
   0xd   :  { %v53_v5 = vld [vmem:[#allocation5 + $0x50] sm:$0xff]  ;;  %v52_v6 = vld [vmem:[#allocation5 + $0x48] sm:$0xff]  ;;  %v51_v7 = vld [vmem:[#allocation5 + $0x40] sm:$0xff]  ;;  %v93_v27 = vshrl.u32 %v92_v22, 7 }
   0xe   :  { %60 = vmatpush.msra.mxu0 %v57_v1  ;;  %v50_v8 = vld [vmem:[#allocation5 + $0x38] sm:$0xff]  ;;  %v49_v9 = vld [vmem:[#allocation5 + $0x30] sm:$0xff]  ;;  %v48_v10 = vld [vmem:[#allocation5 + $0x28] sm:$0xff] }
   0xf   :  { %v47_v11 = vld [vmem:[#allocation5 + $0x20] sm:$0xff]  ;;  %v46_v12 = vld [vmem:[#allocation5 + $0x18] sm:$0xff]  ;;  %v45_v13 = vld [vmem:[#allocation5 + $0x10] sm:$0xff]  ;;  %vm95_vm0 = vcmp.eq.s32.totalorder %v93_v27, 1  ;;  %vm94_vm1 = vcmp.eq.s32.totalorder %v93_v27, 0 }
  0x10   :  { %61 = vmatpush.msra.mxu0 %v56_v2  ;;  %v44_v14 = vld [vmem:[#allocation5 + $0x8] sm:$0xff]  ;;  %v43_v15 = vld [vmem:[#allocation5] sm:$0xff]  ;;  %v42_v16 = vld [vmem:[#allocation2] sm:$0xff] }
  0x12   :  { %62 = vmatpush.msra.mxu0 %v55_v3 }
  0x14   :  { %63 = vmatpush.msra.mxu0 %v54_v4 }
  0x16   :  { %64 = vmatpush.msra.mxu0 %v53_v5 }
  0x18   :  { %65 = vmatpush.msra.mxu0 %v52_v6 }
  0x1a   :  { %66 = vmatpush.msra.mxu0 %v51_v7 }
  0x1c   :  { %67 = vmatpush.msra.mxu0 %v50_v8 }
  0x1e   :  { %68 = vmatpush.msra.mxu0 %v49_v9 }
  0x20   :  { %69 = vmatpush.msra.mxu0 %v48_v10 }
  0x22   :  { %70 = vmatpush.msra.mxu0 %v47_v11 }
  0x24   :  { %71 = vmatpush.msra.mxu0 %v46_v12 }
  0x26   :  { %72 = vmatpush.msra.mxu0 %v45_v13 }
  0x28   :  { %73 = vmatpush.msra.mxu0 %v44_v14 }
  0x2a   :  { %74 = vmatpush.msra.mxu0 %v43_v15 }
  0x2b   :  { %75 = vmatmul.f32.vlgmr.msra.gmra.mxu0 %v42_v16 }
  0xa8   :  { %v76_v17 = vpop.f32.mrf.mxu0 }
  0xa9   :  { %v79_v18 = vrot.slane %v76_v17, 4  ;;  %v85_v19 = vmul.f32 %v76_v17, %v76_v17 }
  0xab   :  { %v80_v20 = vadd.f32 %v79_v18, %v76_v17  ;;  %v86_v21 = vrot.slane %v85_v19, 4 }
  0xad   :  { %v81_v23 = vrot.slane %v80_v20, 2  ;;  %v87_v24 = vadd.f32 %v86_v21, %v85_v19 }
  0xaf   :  { %v82_v25 = vadd.f32 %v81_v23, %v80_v20  ;;  %v88_v26 = vrot.slane %v87_v24, 2 }
  0xb1   :  { %v89_v28 = vadd.f32 %v88_v26, %v87_v24  ;;  %v83_v29 = vrot.slane %v82_v25, 1 }
  0xb3   :  { %v90_v30 = vrot.slane %v89_v28, 1  ;;  %v84_v32 = vadd.f32 %v83_v29, %v82_v25 }
  0xb5   :  { %v91_v31 = vadd.f32 %v90_v30, %v89_v28 }
  0xb7   :  { %v96_v33 = vsel %vm95_vm0, %v91_v31, 0.0 }
  0xb8   :  { %v97_v34 = vsel %vm94_vm1, %v84_v32, %v96_v33 }
  0xb9   :  { %98 = vst [vmem:[#allocation7] sm:$0xff] %v97_v34 }
  0xba   :  { %109 = dma.vmem_to_hbm [thread:$0]  %s105_s1, 128, %s107_s23, [#allocation4]  }
  0xbb   :  { %198 = dma.done.wait [#allocation4], 128  }
  0xbc   :  { %199 = vsyncadd [#allocation4], 4294967168 }
  0xbd   :  { %114 = vsyncpa [#allocation3], 1 }
  0xbe   :  { %115 = vsyncpa [#allocation6], 1 }
  0xbf   :  { %116 = vsyncpa [#allocation4], 1 }

</bundles_post_ra>
